<compile_context>
chip_gen: v7x
topology: tpu7x:2x2x1
jax: 0.10.0
libtpu: 0.0.40
codegen_flags: <defaults>
</compile_context>

<pallas_src>
import math

import jax
import jax.numpy as jnp
from jax import lax
from jax.experimental import pallas as pl
from jax.experimental.pallas import tpu as pltpu

_TWO_PI = 2.0 * math.pi

# murmur3 fmix32 constants as signed int32
_H1 = -2048144789   # 0x85ebca6b
_H2 = -1028477387   # 0xc2b2ae35


def _wrap_i32(v):
    """Wrap a Python int into signed-int32 range."""
    v &= 0xFFFFFFFF
    return v - (1 << 32) if v >= (1 << 31) else v


def _lsr32(x, k):
    """Logical right shift of an int32 array by a static k (arith shift + mask)."""
    mask = jnp.int32((1 << (32 - k)) - 1)
    return jnp.bitwise_and(jnp.right_shift(x, k), mask)


def _hash_i32(x):
    """murmur3 finalizer on int32 arrays (plain jnp ops, interpret-safe)."""
    x = jnp.bitwise_xor(x, _lsr32(x, 16))
    x = x * jnp.int32(_H1)
    x = jnp.bitwise_xor(x, _lsr32(x, 13))
    x = x * jnp.int32(_H2)
    x = jnp.bitwise_xor(x, _lsr32(x, 16))
    return x


def _bits_to_uniform(x):
    """int32 bits -> uniform float32 in [0, 1)."""
    return x.astype(jnp.float32) * (1.0 / 4294967296.0) + 0.5


# ----------------------------------------------------------------------------
# shared per-tile math (time on lanes, harmonic channels on sublanes)
# ----------------------------------------------------------------------------
def _tile_compute(rad, tmp_raw, uv, nz, w, b, cp_ref, cv_ref, sine_amp, noise_std):
    """rad/tmp_raw/nz: (D, Tt); uv: (1, Tt); w: (D, 1); b: (1, 1).
    cp_ref: carried per-harmonic phase (D, 1); cv_ref: carried last tmp column.
    Returns the merged (1, Tt) tile and updates the carries."""
    d, tt = rad.shape
    lane = lax.broadcasted_iota(jnp.int32, (d, tt), 1)

    # tmp_over_one %= 1   (values are non-negative)
    tmp = tmp_raw - jnp.floor(tmp_raw)

    # wrap detection: shift[t] = -1 where tmp[t] - tmp[t-1] < 0
    prev = pltpu.roll(tmp, shift=1, axis=1)
    prev = jnp.where(lane == 0, cv_ref[...], prev)       # carried boundary column
    shift = jnp.where(tmp - prev < 0.0, -1.0, 0.0)

    # inclusive prefix sum along time (lanes): Hillis-Steele scan (log2(Tt) steps)
    x = rad + shift
    acc = x
    s = 1
    while s < tt:
        acc = acc + jnp.where(lane >= s, pltpu.roll(acc, shift=s, axis=1), 0.0)
        s *= 2

    carry = cp_ref[...]                                   # (D, 1)
    phase = acc + carry

    # update carries for the next time tile (f32 throughout; phase stays bounded
    # because the wrap shift subtracts integers)
    cp_ref[...] = carry + jnp.sum(x, axis=1, keepdims=True)
    last = (lane == tt - 1).astype(jnp.float32)
    cv_ref[...] = jnp.sum(tmp * last, axis=1, keepdims=True)

    # sine -> uv gate + noise -> Linear(D->1) + tanh
    sine = jnp.sin(phase * _TWO_PI) * sine_amp
    noise_amp = uv * noise_std + (1.0 - uv) * (sine_amp / 3.0)
    sig = sine * uv + noise_amp * nz
    merged = jnp.sum(sig * w, axis=0, keepdims=True) + b  # sublane reduction
    return jnp.tanh(merged)


def _init_carries(cp_ref, cv_ref):
    @pl.when(pl.program_id(1) == 0)
    def _():
        cp_ref[...] = jnp.zeros(cp_ref.shape, jnp.float32)
        # prev-tmp sentinel: tmp in [0,1), so tmp - (-1) >= 0 -> no wrap at t==0
        cv_ref[...] = jnp.full(cv_ref.shape, -1.0, jnp.float32)


def _make_host_noise_kernel(sine_amp, noise_std):
    def kernel(rad_ref, tmp_ref, uv_ref, nz_ref, w_ref, b_ref,
               out_ref, cp_ref, cv_ref):
        _init_carries(cp_ref, cv_ref)
        out_ref[...] = _tile_compute(rad_ref[...], tmp_ref[...], uv_ref[...],
                                     nz_ref[...], w_ref[...], b_ref[...],
                                     cp_ref, cv_ref, sine_amp, noise_std)
    return kernel


def _make_hash_noise_kernel(sine_amp, noise_std, seed1, seed2, tup):
    def kernel(rad_ref, tmp_ref, uv_ref, w_ref, b_ref,
               out_ref, cp_ref, cv_ref):
        _init_carries(cp_ref, cv_ref)
        d, tt = rad_ref.shape
        # counter-based Gaussian noise: unique int32 counter per element of the
        # virtual (B, D, Tup) noise tensor -> hash -> uniforms -> Box-Muller.
        sub = lax.broadcasted_iota(jnp.int32, (d, tt), 0)
        lane = lax.broadcasted_iota(jnp.int32, (d, tt), 1)
        t_glob = pl.program_id(1) * tt + lane
        gidx = (pl.program_id(0) * d + sub) * tup + t_glob
        h1 = _hash_i32(jnp.bitwise_xor(gidx, jnp.int32(seed1)))
        h2 = _hash_i32(jnp.bitwise_xor(h1, jnp.int32(seed2)))
        u1 = jnp.maximum(_bits_to_uniform(h1), 1e-7)
        u2 = _bits_to_uniform(h2)
        nz = jnp.sqrt(-2.0 * jnp.log(u1)) * jnp.cos(_TWO_PI * u2)
        out_ref[...] = _tile_compute(rad_ref[...], tmp_ref[...], uv_ref[...],
                                     nz, w_ref[...], b_ref[...],
                                     cp_ref, cv_ref, sine_amp, noise_std)
    return kernel


# ----------------------------------------------------------------------------
# plain-JAX glue: SineGen low-rate prep + the two F.interpolate upsamplings
# (channel-major: returns (B, D, Tup), (B, D, Tup), (B, 1, Tup))
# ----------------------------------------------------------------------------
def _sine_gen_prep(f0, upp, key, sampling_rate, harmonic_num, voiced_threshold):
    b, l = f0.shape
    d = harmonic_num + 1
    f0 = f0.astype(jnp.float32)
    mult = jnp.arange(1, d + 1, dtype=jnp.float32)
    f0_buf = f0[:, None, :] * mult[None, :, None]               # (B, D, L)
    rad = (f0_buf / sampling_rate) % 1.0

    rand_ini = jax.random.uniform(key, (b, d), dtype=jnp.float32)
    rand_ini = rand_ini.at[:, 0].set(0.0)
    rad = rad.at[:, :, 0].add(rand_ini)

    cum = jnp.cumsum(rad, axis=2) * upp                          # (B, D, L)

    tup = l * upp
    # F.interpolate(mode='linear', align_corners=True, scale_factor=upp)
    pos = jnp.arange(tup, dtype=jnp.float32) * ((l - 1) / (tup - 1))
    lo = jnp.floor(pos).astype(jnp.int32)
    hi = jnp.minimum(lo + 1, l - 1)
    frac = (pos - lo.astype(jnp.float32))[None, None, :]
    tmp_up = cum[:, :, lo] * (1.0 - frac) + cum[:, :, hi] * frac

    # F.interpolate(mode='nearest', scale_factor=upp)
    nn = jnp.arange(tup, dtype=jnp.int32) // upp
    rad_up = rad[:, :, nn]
    uv = (f0 > voiced_threshold).astype(jnp.float32)[:, None, :]
    uv_up = uv[:, :, nn]
    return rad_up, tmp_up, uv_up


def _pick_time_tile(tup, max_tile=2048):
    if tup <= max_tile:
        return tup
    for cand in range(max_tile, 127, -128):                 # multiple of 128
        if tup % cand == 0:
            return cand
    return tup                                              # fallback: one big tile


# ----------------------------------------------------------------------------
# SourceModuleHnNSF.forward equivalent
# ----------------------------------------------------------------------------
def source_module_hn_nsf(f0, upp, weight, bias, key, *, sampling_rate,
                         harmonic_num=0, sine_amp=0.1, noise_std=0.003,
                         voiced_threshold=0.0, noise=None, noise_seed=0,
                         time_tile=None):
    """f0: (B, L).  Returns (sine_merge (B, L*upp, 1), None, None).
    noise: optional (B, D, L*upp) standard normal (channel-major) for exact
    verification; if None, noise is generated inside the kernel (hash PRNG).
    noise_seed must be a static Python int."""
    # TODO(synk): is_half / fp16 weight-dtype cast of the torch module is not
    # modeled; everything runs in float32.
    rad_up, tmp_up, uv_up = _sine_gen_prep(
        f0, upp, key, sampling_rate, harmonic_num, voiced_threshold)
    b, d, tup = rad_up.shape
    tt = _pick_time_tile(tup) if time_tile is None else time_tile
    assert tup % tt == 0, (tup, tt)
    grid = (b, tup // tt)

    w = weight.astype(jnp.float32).reshape(1, d).T          # (D, 1)
    bb = bias.astype(jnp.float32).reshape(1, 1)             # (1, 1)

    tile_spec = pl.BlockSpec((None, d, tt), lambda bi, ti: (bi, 0, ti))
    row_spec = pl.BlockSpec((None, 1, tt), lambda bi, ti: (bi, 0, ti))
    w_spec = pl.BlockSpec((d, 1), lambda bi, ti: (0, 0))
    b_spec = pl.BlockSpec((1, 1), lambda bi, ti: (0, 0))
    scratch = [pltpu.VMEM((d, 1), jnp.float32),             # carried phase
               pltpu.VMEM((d, 1), jnp.float32)]             # carried last tmp col
    cparams = pltpu.CompilerParams(
        dimension_semantics=("parallel", "arbitrary"))
    out_shape = jax.ShapeDtypeStruct((b, 1, tup), jnp.float32)

    if noise is not None:
        kernel = _make_host_noise_kernel(sine_amp, noise_std)
        out = pl.pallas_call(
            kernel, out_shape=out_shape, grid=grid,
            in_specs=[tile_spec, tile_spec, row_spec, tile_spec, w_spec, b_spec],
            out_specs=row_spec, scratch_shapes=scratch, compiler_params=cparams,
        )(rad_up, tmp_up, uv_up, noise.astype(jnp.float32), w, bb)
    else:
        s = int(noise_seed)
        seed1 = _wrap_i32(s * 2654435761 + 1013904223)
        seed2 = _wrap_i32((s + 0x9E3779B9) * 1103515245 + 12345)
        kernel = _make_hash_noise_kernel(sine_amp, noise_std, seed1, seed2, tup)
        out = pl.pallas_call(
            kernel, out_shape=out_shape, grid=grid,
            in_specs=[tile_spec, tile_spec, row_spec, w_spec, b_spec],
            out_specs=row_spec, scratch_shapes=scratch, compiler_params=cparams,
        )(rad_up, tmp_up, uv_up, w, bb)

    # lane-dense (B, 1, Tup) -> module layout (B, Tup, 1); middle-dim-1 reshape is free
    return out.reshape(b, tup, 1), None, None


# ----------------------------------------------------------------------------
# pure-JAX reference of the same math (channel-major), for correctness check
# ----------------------------------------------------------------------------
def _reference(rad_up, tmp_up, uv_up, nz, weight, bias, sine_amp, noise_std):
    tmp = tmp_up - jnp.floor(tmp_up)
    diff = tmp[:, :, 1:] - tmp[:, :, :-1]
    shift = jnp.concatenate([jnp.zeros_like(tmp[:, :, :1]),
                             jnp.where(diff < 0.0, -1.0, 0.0)], axis=2)
    phase = jnp.cumsum(rad_up + shift, axis=2)
    sine = jnp.sin(phase * _TWO_PI) * sine_amp
    noise_amp = uv_up * noise_std + (1.0 - uv_up) * sine_amp / 3.0
    sig = sine * uv_up + noise_amp * nz
    merged = jnp.einsum("bdt,d->bt", sig, weight.reshape(-1)) + bias.reshape(())
    return jnp.tanh(merged)[:, :, None]


if __name__ == "__main__":
    key = jax.random.PRNGKey(0)
    k_f0, k_v, k_w, k_b, k_ini, k_nz = jax.random.split(key, 6)

    B, L, upp = 2, 32, 8                   # T_up = 256 -> two 128-wide time tiles
    sampling_rate = 16000
    harmonic_num = 8                       # D = 9 harmonic channels
    sine_amp, noise_std, voiced_threshold = 0.1, 0.003, 0.0
    D = harmonic_num + 1
    Tup = L * upp

    # voiced frames ~ [80, 300] Hz with some unvoiced (f0 == 0) frames
    f0 = jax.random.uniform(k_f0, (B, L), minval=80.0, maxval=300.0)
    voiced = jax.random.uniform(k_v, (B, L)) > 0.25
    f0 = jnp.where(voiced, f0, 0.0).astype(jnp.float32)

    bound = 1.0 / math.sqrt(D)             # torch Linear default init range
    weight = jax.random.uniform(k_w, (1, D), minval=-bound, maxval=bound,
                                dtype=jnp.float32)
    bias = jax.random.uniform(k_b, (1,), minval=-bound, maxval=bound,
                              dtype=jnp.float32)

    # ---- verification path: host noise, multi-tile (exercises the carries) ----
    nz = jax.random.normal(k_nz, (B, D, Tup), dtype=jnp.float32)
    out_tiled, _, _ = source_module_hn_nsf(
        f0, upp, weight, bias, k_ini, sampling_rate=sampling_rate,
        harmonic_num=harmonic_num, sine_amp=sine_amp, noise_std=noise_std,
        voiced_threshold=voiced_threshold, noise=nz, time_tile=128)
    out_tiled = jax.block_until_ready(out_tiled)
    assert out_tiled.shape == (B, Tup, 1), out_tiled.shape

    rad_up, tmp_up, uv_up = _sine_gen_prep(
        f0, upp, k_ini, sampling_rate, harmonic_num, voiced_threshold)
    ref = _reference(rad_up, tmp_up, uv_up, nz, weight, bias, sine_amp, noise_std)
    err = float(jnp.max(jnp.abs(out_tiled - ref)))
    assert err < 2e-3, f"multi-tile mismatch vs reference, max abs err = {err}"

    # same inputs, single whole-sequence tile
    out_single, _, _ = source_module_hn_nsf(
        f0, upp, weight, bias, k_ini, sampling_rate=sampling_rate,
        harmonic_num=harmonic_num, sine_amp=sine_amp, noise_std=noise_std,
        voiced_threshold=voiced_threshold, noise=nz)
    out_single = jax.block_until_ready(out_single)
    err1 = float(jnp.max(jnp.abs(out_single - ref)))
    assert err1 < 2e-3, f"single-tile mismatch vs reference, max abs err = {err1}"

    # ---- production path: noise generated in-kernel (no HBM noise tensor) ----
    out_prng, _, _ = source_module_hn_nsf(
        f0, upp, weight, bias, k_ini, sampling_rate=sampling_rate,
        harmonic_num=harmonic_num, sine_amp=sine_amp, noise_std=noise_std,
        voiced_threshold=voiced_threshold, noise=None, noise_seed=1234,
        time_tile=128)
    out_prng = jax.block_until_ready(out_prng)
    assert out_prng.shape == (B, Tup, 1), out_prng.shape
    assert bool(jnp.all(jnp.isfinite(out_prng)))
    assert bool(jnp.all(jnp.abs(out_prng) < 1.0))

    print("KERNEL_OK")
</pallas_src>

<mosaic_0001>
module attributes {stable_mosaic.version = 11 : i64} {
  func.func @kernel(%arg0: i32, %arg1: i32, %arg2: memref<1x9x128xf32, #tpu.memory_space<vmem>>, %arg3: memref<1x9x128xf32, #tpu.memory_space<vmem>>, %arg4: memref<1x1x128xf32, #tpu.memory_space<vmem>>, %arg5: memref<1x9x128xf32, #tpu.memory_space<vmem>>, %arg6: memref<9x1xf32, #tpu.memory_space<vmem>>, %arg7: memref<1x1xf32, #tpu.memory_space<vmem>>, %arg8: memref<1x1x128xf32, #tpu.memory_space<vmem>>, %arg9: memref<9x1xf32, #tpu.memory_space<vmem>>, %arg10: memref<9x1xf32, #tpu.memory_space<vmem>>) attributes {dimension_semantics = [#tpu.dimension_semantics<parallel>, #tpu.dimension_semantics<arbitrary>], iteration_bounds = array<i64: 2, 2>, scalar_prefetch = 0 : i64, scratch_operands = 2 : i64, tpu.core_type = #tpu.core_type<tc>, window_params = [{transform_indices = @transform_0, window_bounds = array<i64: 1, 9, 128>}, {transform_indices = @transform_1, window_bounds = array<i64: 1, 9, 128>}, {transform_indices = @transform_2, window_bounds = array<i64: 1, 1, 128>}, {transform_indices = @transform_3, window_bounds = array<i64: 1, 9, 128>}, {pipeline_mode = #tpu.pipeline_mode<synchronous>, transform_indices = @transform_4, window_bounds = array<i64: 9, 1>}, {pipeline_mode = #tpu.pipeline_mode<synchronous>, transform_indices = @transform_5, window_bounds = array<i64: 1, 1>}, {transform_indices = @transform_6, window_bounds = array<i64: 1, 1, 128>}]} {
    %c0_i32 = arith.constant 0 : i32
    %0 = arith.cmpi eq, %arg1, %c0_i32 : i32
    %1 = arith.extui %0 : i1 to i32
    %c0_i32_0 = arith.constant 0 : i32
    %2 = arith.cmpi ne, %1, %c0_i32_0 : i32
    scf.if %2 {
      %cst_53 = arith.constant 0.000000e+00 : f32
      %114 = vector.broadcast %cst_53 : f32 to vector<9x1xf32>
      %c0_54 = arith.constant 0 : index
      %c0_55 = arith.constant 0 : index
      %115 = vector.load %arg9[%c0_54, %c0_55] : memref<9x1xf32, #tpu.memory_space<vmem>>, vector<9x1xf32>
      tpu.vector_store %arg9[%c0_54, %c0_55], %114 {strides = array<i32>} : memref<9x1xf32, #tpu.memory_space<vmem>>, vector<9x1xf32>,
      %cst_56 = arith.constant -1.000000e+00 : f32
      %116 = vector.broadcast %cst_56 : f32 to vector<9x1xf32>
      %c0_57 = arith.constant 0 : index
      %c0_58 = arith.constant 0 : index
      %117 = vector.load %arg10[%c0_57, %c0_58] : memref<9x1xf32, #tpu.memory_space<vmem>>, vector<9x1xf32>
      tpu.vector_store %arg10[%c0_57, %c0_58], %116 {strides = array<i32>} : memref<9x1xf32, #tpu.memory_space<vmem>>, vector<9x1xf32>,
    } else {
    }
    %c0 = arith.constant 0 : index
    %c0_1 = arith.constant 0 : index
    %c0_2 = arith.constant 0 : index
    %3 = vector.load %arg2[%c0, %c0_1, %c0_2] : memref<1x9x128xf32, #tpu.memory_space<vmem>>, vector<1x9x128xf32>
    %4 = vector.shape_cast %3 : vector<1x9x128xf32> to vector<9x128xf32>
    %c0_3 = arith.constant 0 : index
    %c0_4 = arith.constant 0 : index
    %c0_5 = arith.constant 0 : index
    %5 = vector.load %arg3[%c0_3, %c0_4, %c0_5] : memref<1x9x128xf32, #tpu.memory_space<vmem>>, vector<1x9x128xf32>
    %6 = vector.shape_cast %5 : vector<1x9x128xf32> to vector<9x128xf32>
    %c0_6 = arith.constant 0 : index
    %c0_7 = arith.constant 0 : index
    %c0_8 = arith.constant 0 : index
    %7 = vector.load %arg4[%c0_6, %c0_7, %c0_8] : memref<1x1x128xf32, #tpu.memory_space<vmem>>, vector<1x1x128xf32>
    %8 = vector.shape_cast %7 : vector<1x1x128xf32> to vector<1x128xf32>
    %c0_9 = arith.constant 0 : index
    %c0_10 = arith.constant 0 : index
    %c0_11 = arith.constant 0 : index
    %9 = vector.load %arg5[%c0_9, %c0_10, %c0_11] : memref<1x9x128xf32, #tpu.memory_space<vmem>>, vector<1x9x128xf32>
    %10 = vector.shape_cast %9 : vector<1x9x128xf32> to vector<9x128xf32>
    %c0_12 = arith.constant 0 : index
    %c0_13 = arith.constant 0 : index
    %11 = vector.load %arg6[%c0_12, %c0_13] : memref<9x1xf32, #tpu.memory_space<vmem>>, vector<9x1xf32>
    %c0_14 = arith.constant 0 : index
    %c0_15 = arith.constant 0 : index
    %12 = vector.load %arg7[%c0_14, %c0_15] : memref<1x1xf32, #tpu.memory_space<vmem>>, vector<1x1xf32>
    %13 = tpu.iota {dimensions = array<i32: 1>} : vector<9x128xi32>
    %14 = math.floor %6 : vector<9x128xf32>
    %15 = arith.subf %6, %14 : vector<9x128xf32>
    %c1_i32 = arith.constant 1 : i32
    %16 = tpu.dynamic_rotate %15 by %c1_i32 dim 1 : vector<9x128xf32>, i32 -> vector<9x128xf32>
    %c0_i32_16 = arith.constant 0 : i32
    %17 = vector.broadcast %c0_i32_16 : i32 to vector<9x128xi32>
    %18 = arith.cmpi eq, %13, %17 : vector<9x128xi32>
    %c0_17 = arith.constant 0 : index
    %c0_18 = arith.constant 0 : index
    %19 = vector.load %arg10[%c0_17, %c0_18] : memref<9x1xf32, #tpu.memory_space<vmem>>, vector<9x1xf32>
    %20 = vector.shape_cast %19 : vector<9x1xf32> to vector<9x1xf32>
    %21 = vector.broadcast %20 : vector<9x1xf32> to vector<9x128xf32>
    %22 = arith.select %18, %21, %16 : vector<9x128xi1>, vector<9x128xf32>
    %23 = arith.subf %15, %22 : vector<9x128xf32>
    %cst = arith.constant 0.000000e+00 : f32
    %24 = vector.broadcast %cst : f32 to vector<9x128xf32>
    %25 = arith.cmpf olt, %23, %24 : vector<9x128xf32>
    %cst_19 = arith.constant -1.000000e+00 : f32
    %cst_20 = arith.constant 0.000000e+00 : f32
    %26 = vector.broadcast %cst_19 : f32 to vector<9x128xf32>
    %27 = vector.broadcast %cst_20 : f32 to vector<9x128xf32>
    %28 = arith.select %25, %26, %27 : vector<9x128xi1>, vector<9x128xf32>
    %29 = arith.addf %4, %28 : vector<9x128xf32>
    %c1_i32_21 = arith.constant 1 : i32
    %30 = vector.broadcast %c1_i32_21 : i32 to vector<9x128xi32>
    %31 = arith.cmpi sge, %13, %30 : vector<9x128xi32>
    %c1_i32_22 = arith.constant 1 : i32
    %32 = tpu.dynamic_rotate %29 by %c1_i32_22 dim 1 : vector<9x128xf32>, i32 -> vector<9x128xf32>
    %cst_23 = arith.constant 0.000000e+00 : f32
    %33 = vector.broadcast %cst_23 : f32 to vector<9x128xf32>
    %34 = arith.select %31, %32, %33 : vector<9x128xi1>, vector<9x128xf32>
    %35 = arith.addf %29, %34 : vector<9x128xf32>
    %c2_i32 = arith.constant 2 : i32
    %36 = vector.broadcast %c2_i32 : i32 to vector<9x128xi32>
    %37 = arith.cmpi sge, %13, %36 : vector<9x128xi32>
    %c2_i32_24 = arith.constant 2 : i32
    %38 = tpu.dynamic_rotate %35 by %c2_i32_24 dim 1 : vector<9x128xf32>, i32 -> vector<9x128xf32>
    %cst_25 = arith.constant 0.000000e+00 : f32
    %39 = vector.broadcast %cst_25 : f32 to vector<9x128xf32>
    %40 = arith.select %37, %38, %39 : vector<9x128xi1>, vector<9x128xf32>
    %41 = arith.addf %35, %40 : vector<9x128xf32>
    %c4_i32 = arith.constant 4 : i32
    %42 = vector.broadcast %c4_i32 : i32 to vector<9x128xi32>
    %43 = arith.cmpi sge, %13, %42 : vector<9x128xi32>
    %c4_i32_26 = arith.constant 4 : i32
    %44 = tpu.dynamic_rotate %41 by %c4_i32_26 dim 1 : vector<9x128xf32>, i32 -> vector<9x128xf32>
    %cst_27 = arith.constant 0.000000e+00 : f32
    %45 = vector.broadcast %cst_27 : f32 to vector<9x128xf32>
    %46 = arith.select %43, %44, %45 : vector<9x128xi1>, vector<9x128xf32>
    %47 = arith.addf %41, %46 : vector<9x128xf32>
    %c8_i32 = arith.constant 8 : i32
    %48 = vector.broadcast %c8_i32 : i32 to vector<9x128xi32>
    %49 = arith.cmpi sge, %13, %48 : vector<9x128xi32>
    %c8_i32_28 = arith.constant 8 : i32
    %50 = tpu.dynamic_rotate %47 by %c8_i32_28 dim 1 : vector<9x128xf32>, i32 -> vector<9x128xf32>
    %cst_29 = arith.constant 0.000000e+00 : f32
    %51 = vector.broadcast %cst_29 : f32 to vector<9x128xf32>
    %52 = arith.select %49, %50, %51 : vector<9x128xi1>, vector<9x128xf32>
    %53 = arith.addf %47, %52 : vector<9x128xf32>
    %c16_i32 = arith.constant 16 : i32
    %54 = vector.broadcast %c16_i32 : i32 to vector<9x128xi32>
    %55 = arith.cmpi sge, %13, %54 : vector<9x128xi32>
    %c16_i32_30 = arith.constant 16 : i32
    %56 = tpu.dynamic_rotate %53 by %c16_i32_30 dim 1 : vector<9x128xf32>, i32 -> vector<9x128xf32>
    %cst_31 = arith.constant 0.000000e+00 : f32
    %57 = vector.broadcast %cst_31 : f32 to vector<9x128xf32>
    %58 = arith.select %55, %56, %57 : vector<9x128xi1>, vector<9x128xf32>
    %59 = arith.addf %53, %58 : vector<9x128xf32>
    %c32_i32 = arith.constant 32 : i32
    %60 = vector.broadcast %c32_i32 : i32 to vector<9x128xi32>
    %61 = arith.cmpi sge, %13, %60 : vector<9x128xi32>
    %c32_i32_32 = arith.constant 32 : i32
    %62 = tpu.dynamic_rotate %59 by %c32_i32_32 dim 1 : vector<9x128xf32>, i32 -> vector<9x128xf32>
    %cst_33 = arith.constant 0.000000e+00 : f32
    %63 = vector.broadcast %cst_33 : f32 to vector<9x128xf32>
    %64 = arith.select %61, %62, %63 : vector<9x128xi1>, vector<9x128xf32>
    %65 = arith.addf %59, %64 : vector<9x128xf32>
    %c64_i32 = arith.constant 64 : i32
    %66 = vector.broadcast %c64_i32 : i32 to vector<9x128xi32>
    %67 = arith.cmpi sge, %13, %66 : vector<9x128xi32>
    %c64_i32_34 = arith.constant 64 : i32
    %68 = tpu.dynamic_rotate %65 by %c64_i32_34 dim 1 : vector<9x128xf32>, i32 -> vector<9x128xf32>
    %cst_35 = arith.constant 0.000000e+00 : f32
    %69 = vector.broadcast %cst_35 : f32 to vector<9x128xf32>
    %70 = arith.select %67, %68, %69 : vector<9x128xi1>, vector<9x128xf32>
    %71 = arith.addf %65, %70 : vector<9x128xf32>
    %c0_36 = arith.constant 0 : index
    %c0_37 = arith.constant 0 : index
    %72 = vector.load %arg9[%c0_36, %c0_37] : memref<9x1xf32, #tpu.memory_space<vmem>>, vector<9x1xf32>
    %73 = vector.broadcast %72 : vector<9x1xf32> to vector<9x128xf32>
    %74 = arith.addf %71, %73 : vector<9x128xf32>
    %cst_38 = arith.constant dense<0.000000e+00> : vector<9xf32>
    %75 = vector.multi_reduction <add>, %29, %cst_38 [1] : vector<9x128xf32> to vector<9xf32>
    %76 = vector.shape_cast %75 : vector<9xf32> to vector<9x1xf32>
    %77 = arith.addf %72, %76 : vector<9x1xf32>
    %c0_39 = arith.constant 0 : index
    %c0_40 = arith.constant 0 : index
    %78 = vector.load %arg9[%c0_39, %c0_40] : memref<9x1xf32, #tpu.memory_space<vmem>>, vector<9x1xf32>
    tpu.vector_store %arg9[%c0_39, %c0_40], %77 {strides = array<i32>} : memref<9x1xf32, #tpu.memory_space<vmem>>, vector<9x1xf32>,
    %c127_i32 = arith.constant 127 : i32
    %79 = vector.broadcast %c127_i32 : i32 to vector<9x128xi32>
    %80 = arith.cmpi eq, %13, %79 : vector<9x128xi32>
    %81 = arith.extui %80 : vector<9x128xi1> to vector<9x128xi32>
    %82 = arith.sitofp %81 : vector<9x128xi32> to vector<9x128xf32>
    %83 = arith.mulf %15, %82 : vector<9x128xf32>
    %cst_41 = arith.constant dense<0.000000e+00> : vector<9xf32>
    %84 = vector.multi_reduction <add>, %83, %cst_41 [1] : vector<9x128xf32> to vector<9xf32>
    %85 = vector.shape_cast %84 : vector<9xf32> to vector<9x1xf32>
    %c0_42 = arith.constant 0 : index
    %c0_43 = arith.constant 0 : index
    %86 = vector.load %arg10[%c0_42, %c0_43] : memref<9x1xf32, #tpu.memory_space<vmem>>, vector<9x1xf32>
    tpu.vector_store %arg10[%c0_42, %c0_43], %85 {strides = array<i32>} : memref<9x1xf32, #tpu.memory_space<vmem>>, vector<9x1xf32>,
    %cst_44 = arith.constant 6.28318548 : f32
    %87 = vector.broadcast %cst_44 : f32 to vector<9x128xf32>
    %88 = arith.mulf %74, %87 : vector<9x128xf32>
    %89 = math.sin %88 : vector<9x128xf32>
    %cst_45 = arith.constant 1.000000e-01 : f32
    %90 = vector.broadcast %cst_45 : f32 to vector<9x128xf32>
    %91 = arith.mulf %89, %90 : vector<9x128xf32>
    %cst_46 = arith.constant 3.000000e-03 : f32
    %92 = vector.broadcast %cst_46 : f32 to vector<1x128xf32>
    %93 = arith.mulf %8, %92 : vector<1x128xf32>
    %cst_47 = arith.constant 1.000000e+00 : f32
    %94 = vector.broadcast %cst_47 : f32 to vector<1x128xf32>
    %95 = arith.subf %94, %8 : vector<1x128xf32>
    %cst_48 = arith.constant 0.0333333351 : f32
    %96 = vector.broadcast %cst_48 : f32 to vector<1x128xf32>
    %97 = arith.mulf %95, %96 : vector<1x128xf32>
    %98 = arith.addf %93, %97 : vector<1x128xf32>
    %99 = vector.broadcast %8 : vector<1x128xf32> to vector<9x128xf32>
    %100 = arith.mulf %91, %99 : vector<9x128xf32>
    %101 = vector.broadcast %98 : vector<1x128xf32> to vector<9x128xf32>
    %102 = arith.mulf %101, %10 : vector<9x128xf32>
    %103 = arith.addf %100, %102 : vector<9x128xf32>
    %104 = vector.broadcast %11 : vector<9x1xf32> to vector<9x128xf32>
    %105 = arith.mulf %103, %104 : vector<9x128xf32>
    %cst_49 = arith.constant dense<0.000000e+00> : vector<128xf32>
    %106 = vector.multi_reduction <add>, %105, %cst_49 [0] : vector<9x128xf32> to vector<128xf32>
    %107 = vector.shape_cast %106 : vector<128xf32> to vector<1x128xf32>
    %108 = vector.broadcast %12 : vector<1x1xf32> to vector<1x128xf32>
    %109 = arith.addf %107, %108 : vector<1x128xf32>
    %110 = math.tanh %109 : vector<1x128xf32>
    %c0_50 = arith.constant 0 : index
    %c0_51 = arith.constant 0 : index
    %c0_52 = arith.constant 0 : index
    %111 = vector.load %arg8[%c0_50, %c0_51, %c0_52] : memref<1x1x128xf32, #tpu.memory_space<vmem>>, vector<1x1x128xf32>
    %112 = vector.shape_cast %111 : vector<1x1x128xf32> to vector<1x128xf32>
    %113 = vector.shape_cast %110 : vector<1x128xf32> to vector<1x1x128xf32>
    tpu.vector_store %arg8[%c0_50, %c0_51, %c0_52], %113 {strides = array<i32>} : memref<1x1x128xf32, #tpu.memory_space<vmem>>, vector<1x1x128xf32>,
    return
  }
  func.func @transform_0(%arg0: i32, %arg1: i32) -> (i32, i32, i32) {
    %c0_i32 = arith.constant 0 : i32
    %c0_i32_0 = arith.constant 0 : i32
    return %arg0, %c0_i32, %arg1 : i32, i32, i32
  }
  func.func @transform_1(%arg0: i32, %arg1: i32) -> (i32, i32, i32) {
    %c0_i32 = arith.constant 0 : i32
    %c0_i32_0 = arith.constant 0 : i32
    return %arg0, %c0_i32, %arg1 : i32, i32, i32
  }
  func.func @transform_2(%arg0: i32, %arg1: i32) -> (i32, i32, i32) {
    %c0_i32 = arith.constant 0 : i32
    %c0_i32_0 = arith.constant 0 : i32
    return %arg0, %c0_i32, %arg1 : i32, i32, i32
  }
  func.func @transform_3(%arg0: i32, %arg1: i32) -> (i32, i32, i32) {
    %c0_i32 = arith.constant 0 : i32
    %c0_i32_0 = arith.constant 0 : i32
    return %arg0, %c0_i32, %arg1 : i32, i32, i32
  }
  func.func @transform_4(%arg0: i32, %arg1: i32) -> (i32, i32) {
    %c0_i32 = arith.constant 0 : i32
    %c0_i32_0 = arith.constant 0 : i32
    %c0_i32_1 = arith.constant 0 : i32
    return %c0_i32, %c0_i32_0 : i32, i32
  }
  func.func @transform_5(%arg0: i32, %arg1: i32) -> (i32, i32) {
    %c0_i32 = arith.constant 0 : i32
    %c0_i32_0 = arith.constant 0 : i32
    %c0_i32_1 = arith.constant 0 : i32
    return %c0_i32, %c0_i32_0 : i32, i32
  }
  func.func @transform_6(%arg0: i32, %arg1: i32) -> (i32, i32, i32) {
    %c0_i32 = arith.constant 0 : i32
    %c0_i32_0 = arith.constant 0 : i32
    return %arg0, %c0_i32, %arg1 : i32, i32, i32
  }
}

</mosaic_0001>

<bundles_post_ra>
// kernel: tpu_custom_call.1
= control target key start
LH: loop header
LB: loop body
LE: loop exit
PB: predicated region body
PF: predicated region fallthrough
CT: control target
= control target key end

     0   :  { %s1667_s0 = inlined_call_operand.vmem [shape: f32[2,9,256], index: 0, kind: input, shape index: {}]   ;;  %s1668_s1 = inlined_call_operand.vmem [shape: f32[2,9,256], index: 1, kind: input, shape index: {}]   ;;  %s1669_s2 = inlined_call_operand.vmem [shape: f32[2,1,256], index: 2, kind: input, shape index: {}]   ;;  %s1670_s3 = inlined_call_operand.vmem [shape: f32[2,9,256], index: 3, kind: input, shape index: {}]   ;;  %s1671_s4 = inlined_call_operand.vmem [shape: f32[9,1], index: 4, kind: input, shape index: {}]   ;;  %s1672_s5 = inlined_call_operand.<no memory space> [shape: f32[1,1], index: 5, kind: input, shape index: {}]   ;;  %s1673_s6 = inlined_call_operand.hbm [shape: f32[2,1,256], index: 6, kind: output, shape index: {}]  }
   0x1   :  { %v11_v0 = vstv %s1672_s5 }
   0x2   :  { %12 = vst [vmem:[#allocation4] sm:$0x1] %v11_v0 }
   0x3   :  { %13 = vsyncpa [#allocation9], 0 }
   0x4   :  { %15 = vsyncpa [#allocation9 + $0x1], 0  ;;  %s1317_s23 = smov 0   ;;  %s1319_s24 = smov 0  }
   0x5   :  { %s1321_s25 = smov 0   ;;  %s1323_s26 = smov 0  }
   0x6   :  { %s1325_s27 = smov 0   ;;  %s1327_s28 = smov 0  }
   0x7   :  { %s1329_s29 = smov 0   ;;  %s1331_s30 = smov 0  }
   0x8 LB: > { %s1025_s5 = sadd.s32 4294967295, %s1259_s30   ;;  %s1026_s7 = sadd.s32 4294967294, %s1259_s30   ;;  %s1259_s30 = sphi %s1331_s30, %s21_s30   ;;  %s1255_s29 = sphi %s1329_s29, %s1690_s29   ;;  %s1251_s28 = sphi %s1327_s28, %s1689_s28   ;;  %s1247_s27 = sphi %s1325_s27, %s1688_s27   ;;  %s1243_s26 = sphi %s1323_s26, %s1687_s26   ;;  %s1239_s25 = sphi %s1321_s25, %s1686_s25   ;;  %s1235_s24 = sphi %s1319_s24, %s1685_s24   ;;  %s1231_s23 = sphi %s1317_s23, %s1684_s23  }
   0x9   : > { %s30_s8 = sadd.s32 1, %s1251_s28  ;;  %s33_s9 = sadd.s32 1, %s1255_s29 }
   0xa   : > { %p31_p0 = scmp.ge.s32.totalorder %s30_s8, 2  ;;  %p49_p1 = scmp.ne.s32.totalorder %s1239_s25, %s1235_s24 }
   0xb   : > { %p50_p2 = scmp.eq.s32.totalorder %s1259_s30, 0  ;;  %p207_p5 = scmp.eq.s32.totalorder %s1025_s5, 3 }
   0xc   : > { %s1692_s8 = smov (%p31_p0, %s30_s8), 0  ;;  %s1694_s9 = smov (!%p31_p0, %s33_s9), %s1255_s29 }
   0xd   : > { %s38_s10 = ssub.s32 %s1251_s28, %s1692_s8  ;;  %p1369_p3 = por %p50_p2, %p49_p1 }
   0xe   : > { %p35_p4 = scmp.ge.s32.totalorder %s1694_s9, 2  ;;  %p212_p6 = scmp.ne.s32.totalorder %s1235_s24, %s1231_s23 }
   0xf   : > { %p213_p7 = scmp.eq.s32.totalorder %s1026_s7, 3  ;;  %p1377_p8 = por %p207_p5, %p49_p1 }
  0x10   : > { %s1696_s9 = smov (%p35_p4, %s1694_s9), 0  ;;  %s42_s16 = sadd.s32 1, %s1239_s25 }
  0x11   : > { %1676 = sst [smem:[#allocation11_spill]] %s1696_s9  ;;  %p1381_p9 = por %p213_p7, %p212_p6 }
  0x12   : > { %s37_s14 = ssub.s32 %s1255_s29, %s1696_s9  ;;  %p1028_p11 = scmp.ge.s32.totalorder %s1259_s30, 4 }
  0x13   : > { %s39_s15 = sor.u32 %s38_s10, %s37_s14 }
  0x14   : > { %p40_p10 = scmp.eq.s32.totalorder %s39_s15, 0  ;;  %235 = sbr.rel (%p1028_p11) target bundleno = 48 (0x30), region = 24 }
  0x16   : > { %s1389_s17 = scalar_select %p40_p10, %s1239_s25, %s42_s16  }
  0x1b   : > { %238 = sbr.rel (!%p1369_p3) target bundleno = 34 (0x22), region = 28  ;;  %s240_s18 = sand.u32 (%p1369_p3), 1, %s1239_s25  }
  0x1c   : > { %s1030_s19 = sshll.u32 (%p1369_p3), %s1255_s29, 2  ;;  %s1029_s20 = sshll.u32 (%p1369_p3), %s240_s18, 4 }
  0x1d   : > { %s244_s21 = sadd.s32 (%p1369_p3), %s1251_s28, %s1030_s19  ;;  %s242_s14 = scalar_lea.vmem (%p1369_p3), [#allocation5], %s1029_s20 }
  0x1e   : > { %s1031_s22 = sshll.u32 (%p1369_p3), %s244_s21, 3 }
  0x1f   : > { %s246_s10 = scalar_lea.vmem (%p1369_p3), %s1667_s0, %s1031_s22 }
  0x20   : > { %v276_v1 = vld [vmem:[%s246_s10] sm:$0xff] (%p1369_p3)  ;;  %v278_v2 = vld [vmem:[%s246_s10 + $0x10] sm:$0xff] (%p1369_p3) }
  0x21   : > { %277 = vst [vmem:[%s242_s14] sm:$0xff] (%p1369_p3), %v276_v1  ;;  %279 = vst [vmem:[%s242_s14 + $0x8] sm:$0xff] (%p1369_p3), %v278_v2 }
  0x22 PF: > { %285 = sbr.rel (!%p1369_p3) target bundleno = 41 (0x29), region = 66  ;;  %s287_s15 = sand.u32 (%p1369_p3), 1, %s1239_s25  }
  0x23   : > { %s1033_s16 = sshll.u32 (%p1369_p3), %s1255_s29, 2  ;;  %s1032_s18 = sshll.u32 (%p1369_p3), %s287_s15, 4 }
  0x24   : > { %s291_s19 = sadd.s32 (%p1369_p3), %s1251_s28, %s1033_s16  ;;  %s289_s20 = scalar_lea.vmem (%p1369_p3), [#allocation6], %s1032_s18 }
  0x25   : > { %s1034_s21 = sshll.u32 (%p1369_p3), %s291_s19, 3 }
  0x26   : > { %s293_s22 = scalar_lea.vmem (%p1369_p3), %s1668_s1, %s1034_s21 }
  0x27   : > { %v323_v3 = vld [vmem:[%s293_s22] sm:$0xff] (%p1369_p3)  ;;  %v325_v4 = vld [vmem:[%s293_s22 + $0x10] sm:$0xff] (%p1369_p3) }
  0x28   : > { %324 = vst [vmem:[%s289_s20] sm:$0xff] (%p1369_p3), %v323_v3  ;;  %326 = vst [vmem:[%s289_s20 + $0x8] sm:$0xff] (%p1369_p3), %v325_v4 }
  0x29 PF: > { %342 = sbr.rel (!%p1369_p3) target bundleno = 48 (0x30), region = 108  ;;  %s344_s7 = sand.u32 (%p1369_p3), 1, %s1239_s25  }
  0x2a   : > { %s1036_s10 = sshll.u32 (%p1369_p3), %s1255_s29, 2  ;;  %s1035_s14 = sshll.u32 (%p1369_p3), %s344_s7, 4 }
  0x2b   : > { %s348_s15 = sadd.s32 (%p1369_p3), %s1251_s28, %s1036_s10  ;;  %s346_s18 = scalar_lea.vmem (%p1369_p3), [#allocation7], %s1035_s14 }
  0x2c   : > { %s1037_s16 = sshll.u32 (%p1369_p3), %s348_s15, 3 }
  0x2d   : > { %s350_s21 = scalar_lea.vmem (%p1369_p3), %s1670_s3, %s1037_s16 }
  0x2e   : > { %v380_v5 = vld [vmem:[%s350_s21] sm:$0xff] (%p1369_p3)  ;;  %v382_v6 = vld [vmem:[%s350_s21 + $0x10] sm:$0xff] (%p1369_p3) }
  0x2f   : > { %381 = vst [vmem:[%s346_s18] sm:$0xff] (%p1369_p3), %v380_v5  ;;  %383 = vst [vmem:[%s346_s18 + $0x8] sm:$0xff] (%p1369_p3), %v382_v6 }
  0x30 PF: > { %p1038_p12 = scmp.ge.s32.totalorder %s1259_s30, 1  ;;  %p388_p13 = scmp.lt.s32.totalorder %s1259_s30, 5 }
  0x32   : > { %p389_p0 = pnand %p1038_p12, %p388_p13 }
  0x33   : > { %s1419_s11 = sand.u32 (!%p389_p0), 1, %s1235_s24   ;;  %p452_p1 = scmp.lt.s32.totalorder (!%p389_p0), %s1247_s27, 1 }
  0x34   : > { %392 = sbr.rel (%p389_p0) target bundleno = 1175 (0x497), region = 146  ;;  %s1423_s5 = sshll.u32 (!%p389_p0), %s1419_s11, 4 }
  0x35   : > { %p454_p2 = scmp.lt.s32.totalorder (!%p389_p0), %s1243_s26, 1  ;;  %s397_s19 = scalar_lea.vmem (!%p389_p0), [#allocation5], %s1423_s5 }
  0x36   : > { %s404_s9 = scalar_lea.vmem (!%p389_p0), [#allocation6], %s1423_s5  ;;  %s411_s21 = scalar_lea.vmem (!%p389_p0), [#allocation7], %s1423_s5 }
  0x37   : > { %s451_s18 = scalar_lea.vmem (!%p389_p0), [#allocation8], %s1419_s11  ;;  %p1043_p3 = scmp.ne.s32.totalorder (!%p389_p0), %s1243_s26, 0 }
  0x3b   : > { %s453_s22 = scalar_select %p452_p1, %s1247_s27, 1 }
  0x3c   : > { %s455_s20 = scalar_select %p454_p2, %s1243_s26, 1 }
  0x3d   : > { %s1042_s7 = sshll.u32 %s453_s22, 1  ;;  %462 = sbr.rel (%p1043_p3) target bundleno = 68 (0x44), region = 162  ;;  %vm463_vm0 = vcmask (!%p1043_p3), 7168   ;;  %vm465_vm1 = vcmask (!%p1043_p3), 0   ;;  %v1261_v7 = vmov (!%p1043_p3), 0.0   ;;  %v1262_v8 = vmov (!%p1043_p3), -1.0  }
  0x3e   : > { %s1428_s10 = sadd.s32 %s1042_s7, %s455_s20  ;;  %464 = vst.msk [vmem:[#allocation2] sm:$0xff] (!%p1043_p3), %vm463_vm0, %v1261_v7  ;;  %467 = vst.msk [vmem:[#allocation3] sm:$0xff] (!%p1043_p3), %vm463_vm0, %v1262_v8 }
  0x3f   : > { %s458_s16 = scalar_lea.vmem %s1669_s2, %s1428_s10  ;;  %466 = vst.msk [vmem:[#allocation2 + $0x8] sm:$0x1] (!%p1043_p3), %vm465_vm1, %v1261_v7  ;;  %468 = vst.msk [vmem:[#allocation3 + $0x8] sm:$0x1] (!%p1043_p3), %vm465_vm1, %v1262_v8 }
  0x44 PF: > { %v472_v10 = vld [vmem:[%s404_s9 + $0x8] sm:$0x1]  ;;  %v1263_v11 = vmov 0   ;;  %v471_v13 = vld [vmem:[%s404_s9] sm:$0xff]  ;;  %s1264_s22 = smov 1   ;;  %v479_v18 = vlaneseq  ;;  %v1265_v27 = vmov 0.0  }
  0x45   : > { %1153 = vset.pattern.permute.xlu0 %v1263_v11  ;;  %v482_v12 = vfloor.f32 %v472_v10  ;;  %1154 = vset.pattern.permute.xlu1 %v1263_v11  ;;  %v481_v14 = vfloor.f32 %v471_v13  ;;  %v490_v15 = vld [vmem:[#allocation3] sm:$0xff]  ;;  %v470_v25 = vld [vmem:[%s397_s19 + $0x8] sm:$0x1]  ;;  %s1266_s20 = smov 2   ;;  %s1267_s7 = smov 4   ;;  %v1473_v2 = vld [vmem:[#allocation2] sm:$0xff] }
  0x46   : > { %v491_v9 = vld [vmem:[#allocation3 + $0x8] sm:$0x1]  ;;  %v1446_v19 = vand.u32 127, %v479_v18  ;;  %s1268_s14 = smov 8   ;;  %s1269_s15 = smov 16   ;;  %v476_v11 = vld [vmem:[%s1671_s4] sm:$0xff] }
  0x47   : > { %499 = vperm.xlu0 %1153, %v491_v9   ;;  %v1439_v16 = vsub.f32 %v472_v10, %v482_v12  ;;  %v1442_v17 = vsub.f32 %v471_v13, %v481_v14  ;;  %v469_v32 = vld [vmem:[%s397_s19] sm:$0xff]  ;;  %s1270_s19 = smov 32   ;;  %s1271_s9 = smov 64   ;;  %v478_v10 = vld [vmem:[#allocation4] sm:$0x1]  ;;  %vm591_vm12 = vcmask 1040384  }
  0x48   : > { %vm489_vm2 = vcmp.eq.s32.totalorder %v1446_v19, 0  ;;  %vm512_vm5 = vcmp.ge.s32.totalorder %v1446_v19, 1  ;;  %vm521_vm6 = vcmp.ge.s32.totalorder %v1446_v19, 2  ;;  %vm530_vm7 = vcmp.ge.s32.totalorder %v1446_v19, 4  ;;  %v1470_v0 = vld [vmem:[#allocation2 + $0x8] sm:$0x1] }
  0x49   : > { %487 = vrot.lane.b32.xlu1 %v1439_v16, %s1264_s22  ;;  %vm539_vm8 = vcmp.ge.s32.totalorder %v1446_v19, 8  ;;  %vm548_vm9 = vcmp.ge.s32.totalorder %v1446_v19, 16  ;;  %vm557_vm10 = vcmp.ge.s32.totalorder %v1446_v19, 32  ;;  %v477_v8 = vld [vmem:[%s1671_s4 + $0x8] sm:$0x1]  ;;  %vm601_vm11 = vcmp.eq.s32.totalorder %v1446_v19, 127 }
  0x4a   : > { %v1044_v12 = vsel %vm601_vm11, 1.0, %v1265_v27  ;;  %vm566_vm13 = vcmp.ge.s32.totalorder %v1446_v19, 64  ;;  %s1053_s5 = sshll.u32 %s1247_s27, 1 }
  0x4b   : > { %494 = vperm.xlu0 %1153, %v490_v15   ;;  %v604_v14 = vmul.f32 %v1044_v12, %v1442_v17  ;;  %v605_v15 = vmul.f32 %v1044_v12, %v1439_v16  ;;  %s890_s10 = sadd.s32 %s1243_s26, %s1053_s5  ;;  %s1278_s26 = smov [#allocation8]  }
  0x4c   : > { %s1169_s27 = sshll.u32 %s1278_s26, 4  ;;  %s1170_s27 = int_to_ptr.vmem [resolvable:$false] %s1169_s27 }
  0x4d   : > { %485 = vrot.lane.b32.xlu1 %v1442_v17, %s1264_s22 }
  0xbb   : > { %v488_v20 = vpop.permute.xlu1 %487 }
  0xbf   : > { %v486_v24 = vpop.permute.xlu1 %485 }
  0xc6   : > { %v500_v21 = vpop.permute.xlu0 %499 }
  0xc7   : > { %v503_v22 = vsel %vm489_vm2, %v500_v21, %v488_v20  ;;  %v608_v20 = vsel %vm591_vm12, %v605_v15, 0.0 }
  0xc8   : > { %v505_v23 = vsub.f32 %v1439_v16, %v503_v22 }
  0xca   : > { %vm507_vm3 = vcmp.lt.f32.partialorder %v505_v23, 0.0  ;;  %v495_v26 = vpop.permute.xlu0 %494 }
  0xcb   : > { %v509_v28 = vsel %vm507_vm3, -1.0, %v1265_v27  ;;  %v502_v29 = vsel %vm489_vm2, %v495_v26, %v486_v24 }
  0xcc   : > { %v504_v30 = vsub.f32 %v1442_v17, %v502_v29  ;;  %v1454_v31 = vadd.f32 %v509_v28, %v470_v25 }
  0xce   : > { %vm506_vm4 = vcmp.lt.f32.partialorder %v504_v30, 0.0  ;;  %515 = vrot.lane.b32.xlu0 %v1454_v31, %s1264_s22  ;;  %v592_v13 = vsel %vm591_vm12, %v1454_v31, 0.0 }
  0xcf   : > { %v508_v33 = vsel %vm506_vm4, -1.0, %v1265_v27 }
  0xd0   : > { %v1460_v34 = vadd.f32 %v508_v33, %v469_v32 }
  0xd2   : > { %513 = vrot.lane.b32.xlu1 %v1460_v34, %s1264_s22 }
 0x140   : > { %v516_v35 = vpop.permute.xlu0 %515 }
 0x141   : > { %v518_v36 = vsel %vm512_vm5, %v516_v35, 0.0 }
 0x142   : > { %v520_v37 = vadd.f32 %v518_v36, %v1454_v31 }
 0x144   : > { %524 = vrot.lane.b32.xlu0 %v520_v37, %s1266_s20  ;;  %v514_v38 = vpop.permute.xlu1 %513 }
 0x145   : > { %v517_v39 = vsel %vm512_vm5, %v514_v38, 0.0 }
 0x146   : > { %v519_v40 = vadd.f32 %v517_v39, %v1460_v34 }
 0x148   : > { %522 = vrot.lane.b32.xlu1 %v519_v40, %s1266_s20 }
 0x1b6   : > { %v525_v41 = vpop.permute.xlu0 %524 }
 0x1b7   : > { %v527_v42 = vsel %vm521_vm6, %v525_v41, 0.0 }
 0x1b8   : > { %v529_v43 = vadd.f32 %v527_v42, %v520_v37 }
 0x1ba   : > { %533 = vrot.lane.b32.xlu0 %v529_v43, %s1267_s7  ;;  %v523_v44 = vpop.permute.xlu1 %522 }
 0x1bb   : > { %v526_v45 = vsel %vm521_vm6, %v523_v44, 0.0 }
 0x1bc   : > { %v528_v46 = vadd.f32 %v526_v45, %v519_v40 }
 0x1be   : > { %531 = vrot.lane.b32.xlu1 %v528_v46, %s1267_s7  ;;  %s880_s7 = scalar_lea.sflag [#allocation9], %s1419_s11 }
 0x22c   : > { %v534_v47 = vpop.permute.xlu0 %533 }
 0x22d   : > { %v536_v48 = vsel %vm530_vm7, %v534_v47, 0.0 }
 0x22e   : > { %v538_v49 = vadd.f32 %v536_v48, %v529_v43 }
 0x230   : > { %542 = vrot.lane.b32.xlu0 %v538_v49, %s1268_s14  ;;  %v532_v50 = vpop.permute.xlu1 %531 }
 0x231   : > { %v535_v51 = vsel %vm530_vm7, %v532_v50, 0.0  ;;  %v1273_v50 = vmov 2475754826  }
 0x232   : > { %v537_v52 = vadd.f32 %v535_v51, %v528_v46  ;;  %v1272_v46 = vmov 683565275  }
 0x234   : > { %540 = vrot.lane.b32.xlu1 %v537_v52, %s1268_s14 }
 0x2a2   : > { %v543_v53 = vpop.permute.xlu0 %542 }
 0x2a3   : > { %v545_v54 = vsel %vm539_vm8, %v543_v53, 0.0 }
 0x2a4   : > { %v547_v55 = vadd.f32 %v545_v54, %v538_v49  ;;  %v1275_v54 = vmov 2102212464  }
 0x2a6   : > { %551 = vrot.lane.b32.xlu0 %v547_v55, %s1269_s15  ;;  %v541_v56 = vpop.permute.xlu1 %540 }
 0x2a7   : > { %v544_v57 = vsel %vm539_vm8, %v541_v56, 0.0  ;;  %v1276_v56 = vmov 920167782  }
 0x2a8   : > { %v546_v58 = vadd.f32 %v544_v57, %v537_v52  ;;  %v1274_v52 = vmov 2131351028  }
 0x2aa   : > { %549 = vrot.lane.b32.xlu1 %v546_v58, %s1269_s15  ;;  %s1171_s15 = scalar_lea.vmem %s1170_s27, 32 }
 0x318   : > { %v552_v59 = vpop.permute.xlu0 %551 }
 0x319   : > { %v554_v60 = vsel %vm548_vm9, %v552_v59, 0.0 }
 0x31a   : > { %v556_v61 = vadd.f32 %v554_v60, %v547_v55 }
 0x31c   : > { %560 = vrot.lane.b32.xlu0 %v556_v61, %s1270_s19  ;;  %v550_v62 = vpop.permute.xlu1 %549 }
 0x31d   : > { %v553_v63 = vsel %vm548_vm9, %v550_v62, 0.0 }
 0x31e   : > { %v555_v1 = vadd.f32 %v553_v63, %v546_v58  ;;  %v1277_v63 = vmov 1326507024  }
 0x320   : > { %584 = vperm.xlu0 %1153, %v1470_v0   ;;  %558 = vrot.lane.b32.xlu1 %v555_v1, %s1270_s19 }
 0x324   : > { %579 = vperm.xlu1 %1154, %v1473_v2  }
 0x38e   : > { %v561_v3 = vpop.permute.xlu0 %560 }
 0x38f   : > { %v563_v4 = vsel %vm557_vm10, %v561_v3, 0.0 }
 0x390   : > { %v565_v5 = vadd.f32 %v563_v4, %v556_v61 }
 0x392   : > { %569 = vrot.lane.b32.xlu0 %v565_v5, %s1271_s9  ;;  %v559_v6 = vpop.permute.xlu1 %558 }
 0x393   : > { %v562_v7 = vsel %vm557_vm10, %v559_v6, 0.0 }
 0x394   : > { %v564_v9 = vadd.f32 %v562_v7, %v555_v1 }
 0x396   : > { %854 = vperm.xlu0 %1153, %v477_v8   ;;  %567 = vrot.lane.b32.xlu1 %v564_v9, %s1271_s9 }
 0x39a   : > { %869 = vperm.xlu0 %1153, %v478_v10   ;;  %849 = vperm.xlu1 %1154, %v476_v11  }
 0x39f   : > { %v585_v21 = vpop.permute.xlu0 %584 }
 0x3a3   : > { %v580_v22 = vpop.permute.xlu1 %579 }
 0x3b9   : > { %593 = vadd.xlane.f32.xlu0 %v592_v13 }
 0x3bd   : > { %606 = vadd.xlane.f32.xlu0 %v604_v14 }
 0x3be   : > { %589 = vadd.xlane.f32.xlu1 %v1460_v34 }
 0x3c2   : > { %609 = vadd.xlane.f32.xlu1 %v608_v20 }
 0x404   : > { %v570_v23 = vpop.permute.xlu0 %569 }
 0x405   : > { %v572_v24 = vsel %vm566_vm13, %v570_v23, 0.0 }
 0x406   : > { %v574_v25 = vadd.f32 %v572_v24, %v565_v5 }
 0x408   : > { %v588_v26 = vadd.f32 %v585_v21, %v574_v25  ;;  %v568_v27 = vpop.permute.xlu1 %567 }
 0x409   : > { %v571_v28 = vsel %vm566_vm13, %v568_v27, 0.0  ;;  %vm599_vm13 = vcmask 0  }
 0x40a   : > { %v1492_v29 = vmul.f32 6.2831855, %v588_v26  ;;  %v573_v17 = vadd.f32 %v571_v28, %v564_v9 }
 0x40c   : > { %v719_v16 = vand.u32 2147483647, %v1492_v29  ;;  %v722_v30 = vand.u32 2139095040, %v1492_v29  ;;  %v587_v31 = vadd.f32 %v580_v22, %v573_v17 }
 0x40e   : > { %v723_v32 = vshrl.u32 %v722_v30, 23  ;;  %v1496_v33 = vmul.f32 6.2831855, %v587_v31  ;;  %v726_v19 = vand.u32 8388607, %v719_v16 }
 0x410   : > { %v1049_v34 = vadd.s32 4294967169, %v723_v32  ;;  %v618_v35 = vand.u32 2139095040, %v1496_v33  ;;  %v727_v37 = vor.u32 8388608, %v726_v19  ;;  %v615_v39 = vand.u32 2147483647, %v1496_v33 }
 0x412   : > { %v729_v36 = vadd.s32 1, %v1049_v34  ;;  %v619_v38 = vshrl.u32 %v618_v35, 23  ;;  %v1502_v44 = vshll.u32 %v727_v37, 8  ;;  %v622_v48 = vand.u32 8388607, %v615_v39 }
 0x414   : > { %vm730_vm14 = vcmp.gt.s32.totalorder %v729_v36, 0  ;;  %v1045_v41 = vadd.s32 4294967169, %v619_v38  ;;  %v623_v20 = vor.u32 8388608, %v622_v48 }
 0x415   : > { %v731_v40 = vsel %vm730_vm14, %v729_v36, 0  ;;  %vm597_vm14 = vcmask 7168  }
 0x416   : > { %v732_v42 = vshrl.u32 %v731_v40, 5  ;;  %v733_v43 = vand.u32 31, %v731_v40  ;;  %v625_v49 = vadd.s32 1, %v1045_v41  ;;  %v663_v19 = vshll.u32 %v623_v20, 8 }
 0x418   : > { %v734_v45 = vsub.s32 32, %v733_v43  ;;  %v736_v47 = vshll.u32 %v1272_v46, %v733_v43  ;;  %v739_v51 = vshll.u32 %v1273_v50, %v733_v43  ;;  %v742_v53 = vshll.u32 %v1274_v52, %v733_v43 }
 0x419   : > { %v745_v55 = vshll.u32 %v1275_v54, %v733_v43  ;;  %v748_v57 = vshll.u32 %v1276_v56, %v733_v43  ;;  %vm751_vm15 = vcmp.lt.s32.totalorder %v732_v42, 1  ;;  %vm753_vm0 = vcmp.lt.s32.totalorder %v732_v42, 3 }
 0x41a   : > { %v737_v58 = vshrl.u32 %v1273_v50, %v734_v45  ;;  %v740_v59 = vshrl.u32 %v1274_v52, %v734_v45  ;;  %v743_v60 = vshrl.u32 %v1275_v54, %v734_v45  ;;  %v735_v61 = vshrl.u32 %v1272_v46, %v734_v45 }
 0x41b   : > { %v746_v62 = vshrl.u32 %v1276_v56, %v734_v45  ;;  %v749_v1 = vshrl.u32 %v1277_v63, %v734_v45  ;;  %vm626_vm1 = vcmp.gt.s32.totalorder %v625_v49, 0  ;;  %vm754_vm2 = vcmp.lt.s32.totalorder %v732_v42, 4 }
 0x41c   : > { %v738_v3 = vor.u32 %v737_v58, %v736_v47  ;;  %v741_v4 = vor.u32 %v740_v59, %v739_v51  ;;  %v744_v5 = vor.u32 %v743_v60, %v742_v53  ;;  %v627_v8 = vsel %vm626_vm1, %v625_v49, 0 }
 0x41d   : > { %v747_v6 = vor.u32 %v746_v62, %v745_v55  ;;  %v750_v7 = vor.u32 %v749_v1, %v748_v57  ;;  %vm752_vm3 = vcmp.lt.s32.totalorder %v732_v42, 2  ;;  %v629_v23 = vand.u32 31, %v627_v8 }
 0x41e   : > { %v755_v9 = vsel %vm751_vm15, %v735_v61, %v738_v3  ;;  %v756_v10 = vsel %vm754_vm2, %v744_v5, 2102212464  ;;  %v759_v11 = vsel %vm751_vm15, %v738_v3, %v741_v4  ;;  %v763_v12 = vsel %vm751_vm15, %v741_v4, %v744_v5 }
 0x41f   : > { %v757_v13 = vsel %vm753_vm0, %v741_v4, %v756_v10  ;;  %v760_v14 = vsel %vm754_vm2, %v747_v6, 920167782  ;;  %v764_v15 = vsel %vm754_vm2, %v750_v7, 1326507024  ;;  %v628_v31 = vshrl.u32 %v627_v8, 5 }
 0x420   : > { %v761_v21 = vsel %vm753_vm0, %v744_v5, %v760_v14  ;;  %v765_v22 = vsel %vm753_vm0, %v747_v6, %v764_v15  ;;  %v758_v24 = vsel %vm752_vm3, %v755_v9, %v757_v13  ;;  %v630_v32 = vsub.s32 32, %v629_v23 }
 0x421   : > { %v762_v25 = vsel %vm752_vm3, %v759_v11, %v761_v21  ;;  %v766_v26 = vsel %vm752_vm3, %v763_v12, %v765_v22  ;;  %v774_v34 = vmul.u32 %v1502_v44, %v758_v24  ;;  %v632_v35 = vshll.u32 %v1272_v46, %v629_v23 }
 0x422   : > { %v1515_v27 = vmul.u32.u64.low %v1502_v44, %v766_v26  ;;  %v1516_v28 = vmul.u32.u64.high %v1502_v44, %v766_v26, %v1515_v27  ;;  %v1519_v17 = vmul.u32.u64.low %v1502_v44, %v762_v25  ;;  %v1520_v30 = vmul.u32.u64.high %v1502_v44, %v762_v25, %v1519_v17 }
 0x423   : > { %v635_v36 = vshll.u32 %v1273_v50, %v629_v23  ;;  %v638_v37 = vshll.u32 %v1274_v52, %v629_v23  ;;  %v633_v38 = vshrl.u32 %v1273_v50, %v630_v32  ;;  %v636_v40 = vshrl.u32 %v1274_v52, %v630_v32 }
 0x424   : > { %v639_v41 = vshrl.u32 %v1275_v54, %v630_v32  ;;  %v641_v42 = vshll.u32 %v1275_v54, %v629_v23  ;;  %vm776_vm4 = vc.u32 %v1516_v28, %v1519_v17  ;;  %v777_v43 = vadd.s32 1, %v1520_v30 }
 0x425   : > { %v642_v45 = vshrl.u32 %v1276_v56, %v630_v32  ;;  %v644_v47 = vshll.u32 %v1276_v56, %v629_v23  ;;  %v634_v48 = vor.u32 %v633_v38, %v632_v35  ;;  %v637_v49 = vor.u32 %v636_v40, %v635_v36 }
 0x426   : > { %v640_v51 = vor.u32 %v639_v41, %v638_v37  ;;  %v645_v53 = vshrl.u32 %v1277_v63, %v630_v32  ;;  %v778_v44 = vsel %vm776_vm4, %v777_v43, %v1520_v30  ;;  %vm647_vm5 = vcmp.lt.s32.totalorder %v628_v31, 1 }
 0x427   : > { %v643_v55 = vor.u32 %v642_v45, %v641_v42  ;;  %vm650_vm6 = vcmp.lt.s32.totalorder %v628_v31, 4  ;;  %v779_v50 = vadd.s32 %v778_v44, %v774_v34  ;;  %vm649_vm7 = vcmp.lt.s32.totalorder %v628_v31, 3 }
 0x428   : > { %v646_v52 = vor.u32 %v645_v53, %v644_v47  ;;  %v652_v54 = vsel %vm650_vm6, %v640_v51, 2102212464  ;;  %v631_v57 = vshrl.u32 %v1272_v46, %v630_v32  ;;  %v655_v58 = vsel %vm647_vm5, %v634_v48, %v637_v49  ;;  %v1545_v32 = vpop.permute.xlu0 %854 }
 0x429   : > { %v656_v59 = vsel %vm650_vm6, %v643_v55, 920167782  ;;  %v659_v60 = vsel %vm647_vm5, %v637_v49, %v640_v51  ;;  %v780_v61 = vadd.s32 536870912, %v779_v50  ;;  %vm648_vm8 = vcmp.lt.s32.totalorder %v628_v31, 2 }
 0x42a   : > { %v657_v56 = vsel %vm649_vm7, %v640_v51, %v656_v59  ;;  %v660_v62 = vsel %vm650_vm6, %v646_v52, 1326507024  ;;  %v651_v1 = vsel %vm647_vm5, %v631_v57, %v634_v48  ;;  %v653_v63 = vsel %vm649_vm7, %v637_v49, %v652_v54 }
 0x42b   : > { %v658_v3 = vsel %vm648_vm8, %v655_v58, %v657_v56  ;;  %v661_v4 = vsel %vm649_vm7, %v643_v55, %v660_v62  ;;  %v1530_v5 = vshrl.u32 %v780_v61, 30  ;;  %v654_v11 = vsel %vm648_vm8, %v651_v1, %v653_v63 }
 0x42c   : > { %v662_v6 = vsel %vm648_vm8, %v659_v60, %v661_v4  ;;  %v1532_v7 = vmul.u32.u64.low %v663_v19, %v658_v3  ;;  %v1533_v8 = vmul.u32.u64.high %v663_v19, %v658_v3, %v1532_v7  ;;  %v670_v14 = vmul.u32 %v663_v19, %v654_v11  ;;  %v1549_v47 = vpop.permute.xlu0 %869  ;;  %v473_v11 = vld [vmem:[%s458_s16] sm:$0x1]  ;;  %s1054_s16 = sshll.u32 %s890_s10, 4 }
 0x42d   : > { %v1535_v9 = vmul.u32.u64.low %v663_v19, %v662_v6  ;;  %v1536_v10 = vmul.u32.u64.high %v663_v19, %v662_v6, %v1535_v9  ;;  %v782_v46 = vshll.u32 %v1530_v5, 30  ;;  %v775_v19 = vadd.s32 %v1519_v17, %v1516_v28  ;;  %s1611_s20 = scalar_lea.hbm %s1673_s6, %s1054_s16 }
 0x42e   : > { %v673_v13 = vadd.s32 1, %v1533_v8  ;;  %v805_v55 = vsub.s32 4, %v1530_v5  ;;  %vm721_vm15 = vcmp.lt.s32.totalorder %v1492_v29, 0  ;;  %vm1560_vm0 = vcmp.le.f32.partialorder %v719_v16, 0.7853982 }
 0x42f   : > { %v783_v12 = vsub.s32 %v779_v50, %v782_v46  ;;  %vm672_vm9 = vc.u32 %v1536_v10, %v1532_v7  ;;  %v1552_v50 = vpop.permute.xlu1 %849  ;;  %v671_v54 = vadd.s32 %v1532_v7, %v1536_v10  ;;  %vm617_vm1 = vcmp.lt.s32.totalorder %v1496_v33, 0 }
 0x430   : > { %v674_v20 = vsel %vm672_vm9, %v673_v13, %v1533_v8  ;;  %vm1583_vm2 = vcmp.le.f32.partialorder %v615_v39, 0.7853982  ;;  %vm811_vm6 = vweird.f32 %v1492_v29 }
 0x431   : > { %v785_v15 = vsub.s32 0, %v783_v12  ;;  %v675_v21 = vadd.s32 %v674_v20, %v670_v14 }
 0x433   : > { %v1050_v22 = vmin.u32 %v785_v15, %v783_v12  ;;  %v676_v23 = vadd.s32 536870912, %v675_v21  ;;  %v826_v15 = vsub.f32 1.0, %v473_v11 }
 0x435   : > { %v787_v24 = vclz %v1050_v22  ;;  %v1542_v25 = vshrl.u32 %v676_v23, 30 }
 0x437   : > { %v1051_v26 = vadd.s32 4294967294, %v787_v24  ;;  %v678_v27 = vshll.u32 %v1542_v25, 30  ;;  %v701_v13 = vsub.s32 4, %v1542_v25 }
 0x439   : > { %vm1052_vm10 = vcmp.lt.s32.totalorder %v1051_v26, 0  ;;  %v679_v31 = vsub.s32 %v675_v21, %v678_v27  ;;  %v702_v23 = vsel %vm617_vm1, %v701_v13, %v1542_v25  ;;  %v831_v25 = vshrl.u32 %v479_v18, 7 }
 0x43a   : > { %v790_v30 = vsel %vm1052_vm10, 0, %v1051_v26  ;;  %v704_v39 = vsel %vm1583_vm2, 0, %v702_v23  ;;  %vm707_vm10 = vweird.f32 %v1496_v33 }
 0x43b   : > { %v791_v34 = vsub.s32 32, %v790_v30  ;;  %v795_v35 = vsub.s32 4294967266, %v790_v30  ;;  %v681_v36 = vsub.s32 0, %v679_v31  ;;  %v792_v37 = vshll.u32 %v783_v12, %v790_v30 }
 0x43d   : > { %v793_v38 = vshrl.u32 %v775_v19, %v791_v34  ;;  %v796_v40 = vadd.s32 127, %v795_v35  ;;  %v1046_v41 = vmin.u32 %v681_v36, %v679_v31  ;;  %v827_v19 = vmul.f32 0.033333335, %v826_v15 }
 0x43f   : > { %v794_v42 = vor.u32 %v793_v38, %v792_v37  ;;  %v797_v43 = vshll.u32 %v796_v40, 23  ;;  %v683_v45 = vclz %v1046_v41  ;;  %v708_v40 = vadd.s32 3, %v704_v39 }
 0x441   : > { %v798_v48 = vor.u32 4788187, %v797_v43  ;;  %v1047_v49 = vadd.s32 4294967294, %v683_v45  ;;  %v801_v53 = vcvt.s32.f32 %v794_v42  ;;  %v832_v42 = vsub.s32 0, %v831_v25 }
 0x443   : > { %v799_v51 = vand.u32 2147483647, %v798_v48  ;;  %vm1048_vm11 = vcmp.lt.s32.totalorder %v1047_v49, 0  ;;  %v833_v45 = vrot.slane %v473_v11, %v832_v42 }
 0x444   : > { %v686_v17 = vsel %vm1048_vm11, 0, %v1047_v49  ;;  %v709_v49 = vand.u32 3, %v708_v40 }
 0x445   : > { %v802_v28 = vmul.f32 %v801_v53, %v799_v51  ;;  %v687_v57 = vsub.s32 32, %v686_v17  ;;  %v691_v58 = vsub.s32 4294967266, %v686_v17  ;;  %v688_v60 = vshll.u32 %v679_v31, %v686_v17  ;;  %v475_v51 = vld [vmem:[%s411_s21 + $0x8] sm:$0x1] }
 0x446   : > { %v594_v44 = vpop.xlane.xlu0 %593  ;;  %v825_v31 = vmul.f32 0.003, %v473_v11  ;;  %vm714_vm7 = vcmp.eq.s32.totalorder %v709_v49, 2  ;;  %vm711_vm8 = vcmp.eq.s32.totalorder %v709_v49, 0  ;;  %vm710_vm9 = vcmp.lt.s32.totalorder %v709_v49, 2 }
 0x447   : > { %v596_v52 = vadd.f32 %v594_v44, %v1470_v0  ;;  %v803_v59 = vxor.u32 2147483648, %v802_v28  ;;  %v689_v61 = vshrl.u32 %v671_v54, %v687_v57  ;;  %v692_v56 = vadd.s32 127, %v691_v58 }
 0x448   : > { %v806_v0 = vsel %vm721_vm15, %v805_v55, %v1530_v5  ;;  %v828_v38 = vadd.f32 %v827_v19, %v825_v31 }
 0x449   : > { %600 = vst.msk [vmem:[#allocation2 + $0x8] sm:$0x1] %vm599_vm13, %v596_v52  ;;  %v804_v1 = vsel %vm721_vm15, %v803_v59, %v802_v28  ;;  %v690_v4 = vor.u32 %v689_v61, %v688_v60  ;;  %v693_v6 = vshll.u32 %v692_v56, 23  ;;  %v808_v16 = vsel %vm1560_vm0, 0, %v806_v0  ;;  %v474_v52 = vld [vmem:[%s411_s21] sm:$0xff]  ;;  %s894_s21 = sshll.u32 %s451_s18, 4  ;;  %s1613_s21 = int_to_ptr.vmem [resolvable:$true] %s894_s21 }
 0x44a   : > { %v607_v62 = vpop.xlane.xlu0 %606  ;;  %v807_v7 = vsel %vm1560_vm0, %v1492_v29, %v804_v1  ;;  %v812_v12 = vadd.s32 3, %v808_v16  ;;  %v841_v48 = vrot.slane %v828_v38, %v832_v42  ;;  %s1165_s14 = scalar_lea.vmem %s1613_s21, 16  ;;  %p1172_p7 = scmp.lt.s32.totalorder %s1613_s21, %s1170_s27 }
 0x44b   : > { %v590_v3 = vpop.xlane.xlu1 %589  ;;  %611 = vst.msk [vmem:[#allocation3] sm:$0xff] %vm597_vm14, %v607_v62  ;;  %1155 = vcosq.f32 %v807_v7  ;;  %v694_v9 = vor.u32 4788187, %v693_v6  ;;  %v697_v46 = vcvt.s32.f32 %v690_v4  ;;  %p1166_p4 = scmp.ne.s32.totalorder %s1613_s21, %s1165_s14  ;;  %p1173_p10 = scmp.lt.s32.totalorder %s1171_s15, %s1165_s14 }
 0x44c   : > { %v595_v8 = vadd.f32 %v590_v3, %v1473_v2  ;;  %1157 = vsinq.f32 %v807_v7  ;;  %v813_v20 = vand.u32 3, %v812_v12  ;;  %v844_v17 = vmul.f32 %v841_v48, %v475_v51 }
 0x44d   : > { %v695_v10 = vand.u32 2147483647, %v694_v9  ;;  %v843_v61 = vmul.f32 %v841_v48, %v474_v52  ;;  %v875_v9 = vrot.slane %v1549_v47, %v832_v42  ;;  %p1167_p5 = pnand %p1166_p4, %p1377_p8  ;;  %p1174_p11 = por %p1173_p10, %p1172_p7 }
 0x44e   : > { %598 = vst.msk [vmem:[#allocation2] sm:$0xff] %vm597_vm14, %v595_v8  ;;  %vm818_vm3 = vcmp.eq.s32.totalorder %v813_v20, 2  ;;  %vm815_vm4 = vcmp.eq.s32.totalorder %v813_v20, 0  ;;  %vm814_vm5 = vcmp.lt.s32.totalorder %v813_v20, 2 }
 0x44f   : > { %v610_v5 = vpop.xlane.xlu1 %609  ;;  %v698_v2 = vmul.f32 %v697_v46, %v695_v10  ;;  %p1168_p6 = pneg %p1167_p5 }
 0x450   : > { %612 = vst.msk [vmem:[#allocation3 + $0x8] sm:$0x1] %vm599_vm13, %v610_v5 }
 0x451   : > { %v699_v14 = vxor.u32 2147483648, %v698_v2  ;;  %p1175_p12 = pnand %p1174_p11, %p1168_p6 }
 0x453   : > { %v700_v21 = vsel %vm617_vm1, %v699_v14, %v698_v2 }
 0x454   : > { %v703_v26 = vsel %vm1583_vm2, %v1496_v33, %v700_v21 }
 0x455   : > { %v1156_v24 = vpop.eup %1155  ;;  %1159 = vcosq.f32 %v703_v26 }
 0x456   : > { %v1158_v27 = vpop.eup %1157  ;;  %v819_v30 = vxor.u32 2147483648, %v1156_v24  ;;  %1161 = vsinq.f32 %v703_v26 }
 0x457   : > { %v816_v34 = vxor.u32 2147483648, %v1158_v27 }
 0x458   : > { %v820_v35 = vsel %vm818_vm3, %v819_v30, %v1158_v27 }
 0x459   : > { %v817_v36 = vsel %vm815_vm4, %v1156_v24, %v816_v34 }
 0x45a   : > { %v821_v37 = vsel %vm814_vm5, %v817_v36, %v820_v35 }
 0x45b   : > { %v822_v41 = vsel %vm811_vm6, nan, %v821_v37 }
 0x45c   : > { %v824_v43 = vmul.f32 0.1, %v822_v41 }
 0x45e   : > { %v836_v18 = vmul.f32 %v833_v45, %v824_v43 }
 0x45f   : > { %v1160_v53 = vpop.eup %1159 }
 0x460   : > { %v1162_v44 = vpop.eup %1161  ;;  %v715_v28 = vxor.u32 2147483648, %v1160_v53  ;;  %v846_v58 = vadd.f32 %v844_v17, %v836_v18 }
 0x461   : > { %v712_v55 = vxor.u32 2147483648, %v1162_v44 }
 0x462   : > { %v716_v29 = vsel %vm714_vm7, %v715_v28, %v1162_v44  ;;  %v858_v62 = vmul.f32 %v1545_v32, %v846_v58 }
 0x463   : > { %v713_v54 = vsel %vm711_vm8, %v1160_v53, %v712_v55 }
 0x464   : > { %v717_v57 = vsel %vm710_vm9, %v713_v54, %v716_v29  ;;  %v859_v0 = vsel %vm591_vm12, %v858_v62, 0.0 }
 0x465   : > { %v718_v59 = vsel %vm707_vm10, nan, %v717_v57 }
 0x466   : > { %v823_v60 = vmul.f32 0.1, %v718_v59 }
 0x468   : > { %v835_v56 = vmul.f32 %v833_v45, %v823_v60 }
 0x46a   : > { %v845_v1 = vadd.f32 %v843_v61, %v835_v56 }
 0x46c   : > { %v857_v63 = vmul.f32 %v1552_v50, %v845_v1 }
 0x46e   : > { %v860_v3 = vadd.f32 %v859_v0, %v857_v63 }
 0x470   : > { %v861_v4 = vrot.slane %v860_v3, 4 }
 0x472   : > { %v862_v33 = vadd.f32 %v861_v4, %v860_v3 }
 0x474   : > { %v863_v6 = vrot.slane %v862_v33, 2 }
 0x476   : > { %v864_v7 = vadd.f32 %v863_v6, %v862_v33 }
 0x478   : > { %v865_v8 = vrot.slane %v864_v7, 1 }
 0x47a   : > { %v866_v16 = vadd.f32 %v865_v8, %v864_v7 }
 0x47c   : > { %v876_v5 = vadd.f32 %v875_v9, %v866_v16 }
 0x47e   : > { %1163 = vtanh.f32 %v876_v5 }
 0x488   : > { %v1164_v32 = vpop.eup %1163 }
 0x489   : > { %878 = vst [vmem:[%s451_s18] sm:$0x1] %v1164_v32 }
 0x48a   : > { %1178 = shalt.err (!%p1175_p12)
}
 0x48b   : > { %s1179_s11 = scalar_lea.hbm %s1611_s20, 16  ;;  %s1183_s5 = scalar_lea.hbm %s1673_s6, 64 }
 0x48c   : > { %p1180_p13 = scmp.ne.s32.totalorder %s1611_s20, %s1179_s11  ;;  %p1184_p2 = scmp.lt.u32.totalorder %s1611_s20, %s1673_s6 }
 0x48d   : > { %p1185_p3 = scmp.lt.u32.totalorder %s1183_s5, %s1179_s11  ;;  %p1187_p5 = scmp.lt.u32.totalorder %s1179_s11, %s1611_s20 }
 0x48e   : > { %p1181_p0 = pnand %p1180_p13, %p1377_p8 }
 0x48f   : > { %p1186_p4 = por %p1185_p3, %p1184_p2 }
 0x490   : > { %p1182_p1 = pneg %p1181_p0 }
 0x491   : > { %p1188_p6 = por %p1187_p5, %p1186_p4 }
 0x493   : > { %p1189_p7 = pnand %p1188_p6, %p1182_p1 }
 0x495   : > { %1192 = shalt.err (!%p1189_p7)
}
 0x496   : > { %1065 = dma.vmem_to_hbm [thread:$0]  (%p1377_p8), %s1613_s21, 16, %s1611_s20, %s880_s7  }
 0x497 PF: > { %p1071_p10 = scmp.ge.s32.totalorder %s1259_s30, 2  ;;  %s906_s9 = sand.u32 1, %s1231_s23  }
 0x498   : > { %s907_s22 = scalar_lea.sflag [#allocation9], %s906_s9 }
 0x499   : > { %p1068_p11 = pnand %p1071_p10, %p1381_p9 }
 0x49b   : > { %1226 = dma.done.wait (!%p1068_p11), %s907_s22, 16  }
 0x49c   : > { %1228 = vsyncadd (!%p1068_p11), %s907_s22, 4294967280  ;;  %s21_s30 = sadd.s32 1, %s1259_s30   ;;  %s1683_s12 = sld [smem:[#allocation11_spill]] }
 0x49d   : > { %p18_p12 = scmp.ge.s32.totalorder %s21_s30, 6   ;;  %s1684_s23 = smov %s1235_s24 }
 0x49e   : > { %s1685_s24 = smov %s1239_s25  ;;  %s1686_s25 = smov %s1389_s17 }
 0x49f   : > { %s1687_s26 = smov %s1251_s28  ;;  %s1688_s27 = smov %s1255_s29 }
 0x4a0   : > { %s1689_s28 = smov %s1692_s8  ;;  %20 = sbr.rel (!%p18_p12) target bundleno = 8 (0x8), region = 221 }
 0x4a2   : > { %s1690_s29 = smov %s1683_s12 }
 0x4a7   :  { %911 = vsyncpa [#allocation9], 1 }
 0x4a8   :  { %913 = vsyncpa [#allocation9 + $0x1], 1 }

</bundles_post_ra>
